<compile_context>
chip_gen: v7x
topology: tpu7x:2x2x1
jax: 0.10.0
libtpu: 0.0.40
codegen_flags: <defaults>
</compile_context>

<pallas_src>
import numpy as np
import jax
import jax.numpy as jnp
from jax.experimental import pallas as pl
from jax.experimental.pallas import tpu as pltpu


# ----------------------------------------------------------------------------
# Pallas kernels
# ----------------------------------------------------------------------------
def _make_matmul_kernel(has_res: bool, relu: bool):
    """Tiled bf16 matmul, f32 accumulator, fused BN shift (+residual init, +ReLU)."""

    def kernel(*refs):
        if has_res:
            a_ref, b_ref, t_ref, r_ref, o_ref, acc_ref = refs
        else:
            a_ref, b_ref, t_ref, o_ref, acc_ref = refs
            r_ref = None

        k = pl.program_id(2)

        @pl.when(k == 0)
        def _():
            if has_res:
                # Residual goes straight into the accumulator -> its add overlaps the K loop.
                acc_ref[...] = r_ref[...].astype(jnp.float32)
            else:
                acc_ref[...] = jnp.zeros_like(acc_ref)

        acc_ref[...] += jnp.dot(
            a_ref[...], b_ref[...], preferred_element_type=jnp.float32
        )

        @pl.when(k == pl.num_programs(2) - 1)
        def _():
            y = acc_ref[...] + t_ref[...]          # BN shift (scale folded into weights)
            if relu:
                y = jnp.maximum(y, 0.0)
            o_ref[...] = y.astype(o_ref.dtype)

    return kernel


def _maxpool_kernel(x_ref, o_ref):
    # x_ref: (9, tm, cols) -- the 9 shifted 3x3 window taps; reduce over the taps.
    o_ref[...] = jnp.max(x_ref[...], axis=0)


def _avgpool_kernel(x_ref, o_ref, acc_ref, *, inv_hw):
    @pl.when(pl.program_id(0) == 0)
    def _():
        acc_ref[...] = jnp.zeros_like(acc_ref)

    acc_ref[...] += jnp.sum(x_ref[...].astype(jnp.float32), axis=1)

    @pl.when(pl.program_id(0) == pl.num_programs(0) - 1)
    def _():
        o_ref[...] = acc_ref[...] * inv_hw


# ----------------------------------------------------------------------------
# Pallas wrappers
# ----------------------------------------------------------------------------
def _ceil_to(x, m):
    return (x + m - 1) // m * m


def _pad2(x, rows, cols, value=0.0):
    r, c = x.shape
    if r == rows and c == cols:
        return x                                   # skip redundant pad copies
    return jnp.pad(x, ((0, rows - r), (0, cols - c)), constant_values=value)


def matmul_bn_act(a, b, shift, residual=None, relu=True):
    """(M,K)@(K,N) + shift [+residual] [ReLU]; bf16 operands, f32 accumulation."""
    M, K = a.shape
    _, N = b.shape

    # Adaptive M tile: no padding to 128 for the tiny late-stage M.
    tm = min(128, _ceil_to(M, 8))
    Mp = _ceil_to(M, tm)

    # N tile: 256 to fill the v6e/v7x MXU, but keep >=2 grid blocks when M has only one
    # block (so v7x's second TensorCore has work); v5e just sees two 128-wide passes.
    Np = _ceil_to(N, 128)
    if Np % 256 == 0 and (Mp // tm > 1 or Np >= 512):
        tn = 256
    else:
        tn = 128

    # K tile: bigger tiles for the long-K late-layer matmuls (fewer grid steps).
    Kp = _ceil_to(K, 128)
    if Kp % 512 == 0 and K > 1024:
        tk = 512
    elif Kp % 256 == 0 and K > 256:
        tk = 256
    else:
        tk = 128

    a_p = _pad2(a.astype(jnp.bfloat16), Mp, Kp)
    b_p = _pad2(b.astype(jnp.bfloat16), Kp, Np)
    t_p = _pad2(shift.reshape(1, N).astype(jnp.float32), 1, Np)

    has_res = residual is not None
    inputs = [a_p, b_p, t_p]
    in_specs = [
        pl.BlockSpec((tm, tk), lambda i, j, k: (i, k)),
        pl.BlockSpec((tk, tn), lambda i, j, k: (k, j)),
        pl.BlockSpec((1, tn), lambda i, j, k: (0, j)),
    ]
    if has_res:
        inputs.append(_pad2(residual.astype(jnp.bfloat16), Mp, Np))
        in_specs.append(pl.BlockSpec((tm, tn), lambda i, j, k: (i, j)))

    out = pl.pallas_call(
        _make_matmul_kernel(has_res, relu),
        out_shape=jax.ShapeDtypeStruct((Mp, Np), jnp.bfloat16),
        grid_spec=pltpu.PrefetchScalarGridSpec(
            num_scalar_prefetch=0,
            grid=(Mp // tm, Np // tn, Kp // tk),
            in_specs=in_specs,
            out_specs=pl.BlockSpec((tm, tn), lambda i, j, k: (i, j)),
            scratch_shapes=[pltpu.VMEM((tm, tn), jnp.float32)],
        ),
        compiler_params=pltpu.CompilerParams(
            dimension_semantics=("parallel", "parallel", "arbitrary")
        ),
    )(*inputs)
    return out[:M, :N]


def maxpool_3x3_s2_p1(x):
    """PyTorch MaxPool2d(kernel_size=3, stride=2, padding=1) on NHWC bf16 input."""
    B, H, W, C = x.shape
    oh = (H + 2 - 3) // 2 + 1
    ow = (W + 2 - 3) // 2 + 1
    xp = jnp.pad(x, ((0, 0), (1, 1), (1, 1), (0, 0)), constant_values=-jnp.inf)
    views = [
        xp[:, i:i + 2 * (oh - 1) + 1:2, j:j + 2 * (ow - 1) + 1:2, :]
        for i in range(3) for j in range(3)
    ]

    # Lane-dense layout: fold ow*C into the lane axis when 128-aligned (unmasked stores).
    if (ow * C) % 128 == 0:
        rows, cols = B * oh, ow * C
    else:
        rows, cols = B * oh * ow, C
    stacked = jnp.stack(views, axis=0).reshape(9, rows, cols)

    tm = min(128, _ceil_to(rows, 8))
    rows_p = _ceil_to(rows, tm)
    if rows_p != rows:
        stacked = jnp.pad(stacked, ((0, 0), (0, rows_p - rows), (0, 0)),
                          constant_values=-jnp.inf)

    out = pl.pallas_call(
        _maxpool_kernel,
        out_shape=jax.ShapeDtypeStruct((rows_p, cols), x.dtype),
        grid=(rows_p // tm,),
        in_specs=[pl.BlockSpec((9, tm, cols), lambda i: (0, i, 0))],
        out_specs=pl.BlockSpec((tm, cols), lambda i: (i, 0)),
    )(stacked)
    return out[:rows].reshape(B, oh, ow, C)


def global_avgpool(x):
    """AdaptiveAvgPool2d((1,1)) + flatten on NHWC input -> (B, C) float32."""
    B, H, W, C = x.shape
    HW = H * W
    x2 = x.reshape(B, HW, C)

    # Spatial tiling so large inputs never exceed VMEM; tiny inputs run in one step.
    if HW > 512 and HW % 8 == 0:
        th = 512
        while HW % th:
            th //= 2
    else:
        th = HW

    kernel = lambda x_ref, o_ref, acc_ref: _avgpool_kernel(
        x_ref, o_ref, acc_ref, inv_hw=1.0 / HW)

    return pl.pallas_call(
        kernel,
        out_shape=jax.ShapeDtypeStruct((B, C), jnp.float32),
        grid_spec=pltpu.PrefetchScalarGridSpec(
            num_scalar_prefetch=0,
            grid=(HW // th,),
            in_specs=[pl.BlockSpec((B, th, C), lambda s: (0, s, 0))],
            out_specs=pl.BlockSpec((B, C), lambda s: (0, 0)),
            scratch_shapes=[pltpu.VMEM((B, C), jnp.float32)],
        ),
        compiler_params=pltpu.CompilerParams(dimension_semantics=("arbitrary",)),
    )(x2)


# ----------------------------------------------------------------------------
# Conv / BN / ResNet-50 plumbing (glue in plain JAX, hot path in Pallas)
# ----------------------------------------------------------------------------
def _im2col(x, kh, kw, stride, pad):
    B, H, W, C = x.shape
    if pad:
        x = jnp.pad(x, ((0, 0), (pad, pad), (pad, pad), (0, 0)))
    Hp, Wp = H + 2 * pad, W + 2 * pad
    oh = (Hp - kh) // stride + 1
    ow = (Wp - kw) // stride + 1
    cols = []
    for i in range(kh):
        for j in range(kw):
            cols.append(
                x[:, i:i + stride * (oh - 1) + 1:stride,
                  j:j + stride * (ow - 1) + 1:stride, :]
            )
    patches = jnp.concatenate(cols, axis=-1)  # (B, oh, ow, kh*kw*C), bf16
    return patches.reshape(B * oh * ow, kh * kw * C), (B, oh, ow)


def conv_bn(x, w, bn, stride, pad, relu=True, residual=None):
    """x: NHWC bf16, w: (Cout, Cin, kh, kw) f32 PyTorch layout. Returns NHWC bf16."""
    cout, cin, kh, kw = w.shape
    patches, (B, oh, ow) = _im2col(x, kh, kw, stride, pad)

    gamma, beta, mean, var = bn
    scale = gamma * jax.lax.rsqrt(var + 1e-5)
    shift = beta - mean * scale

    # Fold the BN scale into the (per-output-channel) weight columns.
    wm = jnp.transpose(w, (2, 3, 1, 0)).reshape(kh * kw * cin, cout) * scale[None, :]

    res2d = residual.reshape(B * oh * ow, cout) if residual is not None else None
    out = matmul_bn_act(patches, wm, shift, residual=res2d, relu=relu)
    return out.reshape(B, oh, ow, cout)


def bottleneck(x, p, stride):
    identity = x
    out = conv_bn(x, p["conv1"], p["bn1"], stride=1, pad=0, relu=True)
    out = conv_bn(out, p["conv2"], p["bn2"], stride=stride, pad=1, relu=True)
    if "down_conv" in p:
        identity = conv_bn(x, p["down_conv"], p["down_bn"],
                           stride=stride, pad=0, relu=False)
    out = conv_bn(out, p["conv3"], p["bn3"], stride=1, pad=0,
                  relu=True, residual=identity)
    return out


def resnet50_forward(frames_nchw, params):
    """frames_nchw: (N, 3, H, W) float32 -> features (N, 2048) float32."""
    x = jnp.transpose(frames_nchw, (0, 2, 3, 1)).astype(jnp.bfloat16)  # NCHW -> NHWC bf16
    x = conv_bn(x, params["conv1"], params["bn1"], stride=2, pad=3, relu=True)
    x = maxpool_3x3_s2_p1(x)
    for li, (nblocks, stride) in enumerate(zip((3, 4, 6, 3), (1, 2, 2, 2)), start=1):
        for b in range(nblocks):
            x = bottleneck(x, params[f"layer{li}"][b], stride if b == 0 else 1)
    fts = global_avgpool(x)          # (N, 2048), already flattened
    return fts                       # == fts.view(-1, fts.shape[1])


# ----------------------------------------------------------------------------
# Deterministic parameter construction (shapes of torchvision resnet50)
# ----------------------------------------------------------------------------
class _KeyGen:
    def __init__(self, key):
        self._key = key
        self._i = 0

    def __call__(self):
        self._i += 1
        return jax.random.fold_in(self._key, self._i)


def _init_conv(kg, cout, cin, kh, kw):
    fan_in = cin * kh * kw
    return jax.random.normal(kg(), (cout, cin, kh, kw), jnp.float32) * (
        1.0 / np.sqrt(fan_in)
    )


def _init_bn(kg, c):
    gamma = 1.0 + 0.1 * jax.random.normal(kg(), (c,), jnp.float32)
    beta = 0.1 * jax.random.normal(kg(), (c,), jnp.float32)
    mean = 0.1 * jax.random.normal(kg(), (c,), jnp.float32)
    var = 1.0 + 0.1 * jax.random.uniform(kg(), (c,), jnp.float32)
    return (gamma, beta, mean, var)


def init_resnet50_params(key):
    kg = _KeyGen(key)
    params = {
        "conv1": _init_conv(kg, 64, 3, 7, 7),
        "bn1": _init_bn(kg, 64),
    }
    inplanes = 64
    for li, (planes, nblocks, stride) in enumerate(
        zip((64, 128, 256, 512), (3, 4, 6, 3), (1, 2, 2, 2)), start=1
    ):
        blocks = []
        for b in range(nblocks):
            s = stride if b == 0 else 1
            blk = {
                "conv1": _init_conv(kg, planes, inplanes, 1, 1),
                "bn1": _init_bn(kg, planes),
                "conv2": _init_conv(kg, planes, planes, 3, 3),
                "bn2": _init_bn(kg, planes),
                "conv3": _init_conv(kg, planes * 4, planes, 1, 1),
                "bn3": _init_bn(kg, planes * 4),
            }
            if s != 1 or inplanes != planes * 4:
                blk["down_conv"] = _init_conv(kg, planes * 4, inplanes, 1, 1)
                blk["down_bn"] = _init_bn(kg, planes * 4)
            inplanes = planes * 4
            blocks.append(blk)
        params[f"layer{li}"] = blocks
    return params


# ----------------------------------------------------------------------------
if __name__ == "__main__":
    key = jax.random.PRNGKey(0)
    pkey, xkey = jax.random.split(key)

    params = init_resnet50_params(pkey)
    # Small but architecture-consistent input: batch=2, 3 channels, 64x64 spatial (NCHW).
    frames = jax.random.normal(xkey, (2, 3, 64, 64), jnp.float32)

    fts = resnet50_forward(frames, params)
    fts = jax.block_until_ready(fts)

    assert fts.shape == (2, 2048), fts.shape
    assert bool(jnp.all(jnp.isfinite(fts)))
    print("KERNEL_OK")
</pallas_src>

<mosaic_0001>
module attributes {stable_mosaic.version = 11 : i64} {
  func.func @kernel(%arg0: i32, %arg1: i32, %arg2: i32, %arg3: memref<128x128xbf16, #tpu.memory_space<vmem>>, %arg4: memref<128x128xbf16, #tpu.memory_space<vmem>>, %arg5: memref<1x128xf32, #tpu.memory_space<vmem>>, %arg6: memref<128x128xbf16, #tpu.memory_space<vmem>>, %arg7: memref<128x128xf32, #tpu.memory_space<vmem>>) attributes {dimension_semantics = [#tpu.dimension_semantics<parallel>, #tpu.dimension_semantics<parallel>, #tpu.dimension_semantics<arbitrary>], iteration_bounds = array<i64: 16, 1, 2>, scalar_prefetch = 0 : i64, scratch_operands = 1 : i64, tpu.core_type = #tpu.core_type<tc>, window_params = [{transform_indices = @transform_0, window_bounds = array<i64: 128, 128>}, {transform_indices = @transform_1, window_bounds = array<i64: 128, 128>}, {transform_indices = @transform_2, window_bounds = array<i64: 1, 128>}, {transform_indices = @transform_3, window_bounds = array<i64: 128, 128>}]} {
    %c0_i32 = arith.constant 0 : i32
    %0 = arith.cmpi eq, %arg2, %c0_i32 : i32
    %1 = arith.extui %0 : i1 to i32
    %c0_i32_0 = arith.constant 0 : i32
    %2 = arith.cmpi ne, %1, %c0_i32_0 : i32
    scf.if %2 {
      %cst_9 = arith.constant 0.000000e+00 : f32
      %12 = vector.broadcast %cst_9 : f32 to vector<128x128xf32>
      %c0_10 = arith.constant 0 : index
      %c0_11 = arith.constant 0 : index
      %13 = vector.load %arg7[%c0_10, %c0_11] : memref<128x128xf32, #tpu.memory_space<vmem>>, vector<128x128xf32>
      tpu.vector_store %arg7[%c0_10, %c0_11], %12 {strides = array<i32>} : memref<128x128xf32, #tpu.memory_space<vmem>>, vector<128x128xf32>,
    } else {
    }
    %c0 = arith.constant 0 : index
    %c0_1 = arith.constant 0 : index
    %3 = vector.load %arg7[%c0, %c0_1] : memref<128x128xf32, #tpu.memory_space<vmem>>, vector<128x128xf32>
    %c0_2 = arith.constant 0 : index
    %c0_3 = arith.constant 0 : index
    %4 = vector.load %arg3[%c0_2, %c0_3] : memref<128x128xbf16, #tpu.memory_space<vmem>>, vector<128x128xbf16>
    %c0_4 = arith.constant 0 : index
    %c0_5 = arith.constant 0 : index
    %5 = vector.load %arg4[%c0_4, %c0_5] : memref<128x128xbf16, #tpu.memory_space<vmem>>, vector<128x128xbf16>
    %cst = arith.constant dense<0.000000e+00> : vector<128x128xf32>
    %6 = tpu.matmul %4, %5, %cst {dimension_numbers = #tpu.dot_dimension_numbers<[1], [0], [0], [1], [0, 0, 1, 1], [], []>} : vector<128x128xbf16>, vector<128x128xbf16>, vector<128x128xf32> -> vector<128x128xf32>
    %7 = arith.addf %3, %6 : vector<128x128xf32>
    %c0_6 = arith.constant 0 : index
    %c0_7 = arith.constant 0 : index
    %8 = vector.load %arg7[%c0_6, %c0_7] : memref<128x128xf32, #tpu.memory_space<vmem>>, vector<128x128xf32>
    tpu.vector_store %arg7[%c0_6, %c0_7], %7 {strides = array<i32>} : memref<128x128xf32, #tpu.memory_space<vmem>>, vector<128x128xf32>,
    %c1_i32 = arith.constant 1 : i32
    %9 = arith.cmpi eq, %arg2, %c1_i32 : i32
    %10 = arith.extui %9 : i1 to i32
    %c0_i32_8 = arith.constant 0 : i32
    %11 = arith.cmpi ne, %10, %c0_i32_8 : i32
    scf.if %11 {
      %c0_9 = arith.constant 0 : index
      %c0_10 = arith.constant 0 : index
      %12 = vector.load %arg7[%c0_9, %c0_10] : memref<128x128xf32, #tpu.memory_space<vmem>>, vector<128x128xf32>
      %c0_11 = arith.constant 0 : index
      %c0_12 = arith.constant 0 : index
      %13 = vector.load %arg5[%c0_11, %c0_12] : memref<1x128xf32, #tpu.memory_space<vmem>>, vector<1x128xf32>
      %14 = vector.broadcast %13 : vector<1x128xf32> to vector<128x128xf32>
      %15 = arith.addf %12, %14 : vector<128x128xf32>
      %cst_13 = arith.constant 0.000000e+00 : f32
      %16 = vector.broadcast %cst_13 : f32 to vector<128x128xf32>
      %17 = arith.maximumf %15, %16 : vector<128x128xf32>
      %18 = arith.truncf %17 : vector<128x128xf32> to vector<128x128xbf16>
      %c0_14 = arith.constant 0 : index
      %c0_15 = arith.constant 0 : index
      %19 = vector.load %arg6[%c0_14, %c0_15] : memref<128x128xbf16, #tpu.memory_space<vmem>>, vector<128x128xbf16>
      tpu.vector_store %arg6[%c0_14, %c0_15], %18 {strides = array<i32>} : memref<128x128xbf16, #tpu.memory_space<vmem>>, vector<128x128xbf16>,
    } else {
    }
    return
  }
  func.func @transform_0(%arg0: i32, %arg1: i32, %arg2: i32) -> (i32, i32) {
    %c0_i32 = arith.constant 0 : i32
    return %arg0, %arg2 : i32, i32
  }
  func.func @transform_1(%arg0: i32, %arg1: i32, %arg2: i32) -> (i32, i32) {
    %c0_i32 = arith.constant 0 : i32
    return %arg2, %arg1 : i32, i32
  }
  func.func @transform_2(%arg0: i32, %arg1: i32, %arg2: i32) -> (i32, i32) {
    %c0_i32 = arith.constant 0 : i32
    %c0_i32_0 = arith.constant 0 : i32
    return %c0_i32, %arg1 : i32, i32
  }
  func.func @transform_3(%arg0: i32, %arg1: i32, %arg2: i32) -> (i32, i32) {
    %c0_i32 = arith.constant 0 : i32
    return %arg0, %arg1 : i32, i32
  }
}

</mosaic_0001>

<bundles_post_ra>
// kernel: tpu_custom_call.1
= control target key start
LH: loop header
LB: loop body
LE: loop exit
PB: predicated region body
PF: predicated region fallthrough
CT: control target
= control target key end

     0   :  { %s1811_s0 = inlined_call_operand.hbm [shape: bf16[2048,256], index: 0, kind: input, shape index: {}]   ;;  %s1812_s1 = inlined_call_operand.hbm [shape: bf16[256,128], index: 1, kind: input, shape index: {}]   ;;  %s1813_s2 = inlined_call_operand.vmem [shape: f32[1,128], index: 2, kind: input, shape index: {}]   ;;  %s1814_s3 = inlined_call_operand.hbm [shape: bf16[2048,128], index: 3, kind: output, shape index: {}]  }
   0x1   :  { %1826 = sst [smem:[#allocation17_spill]] %s1811_s0 }
   0x2   :  { %1827 = sst [smem:[#allocation18_spill]] %s1812_s1 }
   0x3   :  { %1828 = sst [smem:[#allocation19_spill]] %s1813_s2 }
   0x4   :  { %1829 = sst [smem:[#allocation20_spill]] %s1814_s3 }
   0x5   :  { %8 = vsyncpa [#allocation4], 0 }
   0x6   :  { %10 = vsyncpa [#allocation4 + $0x1], 0 }
   0x7   :  { %11 = vsyncpa [#allocation7], 0 }
   0x8   :  { %13 = vsyncpa [#allocation7 + $0x1], 0 }
   0x9   :  { %14 = vsyncpa [#allocation5], 0 }
   0xa   :  { %16 = vsyncpa [#allocation5 + $0x1], 0  ;;  %s1430_s12 = smov 0   ;;  %s1432_s13 = smov 0  }
   0xb   :  { %s1434_s14 = smov 0   ;;  %s1436_s15 = smov 0  }
   0xc   :  { %s1438_s16 = smov 0   ;;  %s1440_s17 = smov 0  }
   0xd   :  { %s1442_s18 = smov 0   ;;  %s1444_s19 = smov 0  }
   0xe   :  { %s1446_s20 = smov 0   ;;  %s1448_s21 = smov 0  }
   0xf   :  { %s1450_s22 = smov 0   ;;  %s1452_s23 = smov 0  }
  0x10   :  { %s1454_s24 = smov 0   ;;  %s1456_s25 = smov 0  }
  0x11 LB: > { %1830 = sst [smem:[#allocation12_spill]] %s1347_s12  ;;  %s34_s26 = sadd.s32 1, %s1391_s23  ;;  %s1399_s25 = sphi %s1456_s25, %s22_s25   ;;  %s1395_s24 = sphi %s1454_s24, %s1878_s24   ;;  %s1391_s23 = sphi %s1452_s23, %s1877_s23   ;;  %s1387_s22 = sphi %s1450_s22, %s1876_s22   ;;  %s1383_s21 = sphi %s1448_s21, %s1875_s21   ;;  %s1379_s20 = sphi %s1446_s20, %s1874_s20   ;;  %s1375_s19 = sphi %s1444_s19, %s1873_s19   ;;  %s1371_s18 = sphi %s1442_s18, %s1872_s18   ;;  %s1367_s17 = sphi %s1440_s17, %s1871_s17   ;;  %s1363_s16 = sphi %s1438_s16, %s1870_s16   ;;  %s1359_s15 = sphi %s1436_s15, %s1869_s15   ;;  %s1355_s14 = sphi %s1434_s14, %s1868_s14   ;;  %s1351_s13 = sphi %s1432_s13, %s1867_s13   ;;  %s1347_s12 = sphi %s1430_s12, %s1866_s12  }
  0x12   : > { %1831 = sst [smem:[#allocation13_spill]] %s1383_s21  ;;  %s41_s27 = sadd.s32 1, %s1395_s24 }
  0x13   : > { %1832 = sst [smem:[#allocation14_spill]] %s1387_s22  ;;  %p35_p0 = scmp.ge.s32.totalorder %s34_s26, 2 }
  0x14   : > { %s50_s28 = sadd.s32 1, %s1379_s20  ;;  %p57_p1 = scmp.ne.s32.totalorder %s1379_s20, %s1375_s19 }
  0x15   : > { %p1819_p2 = scmp.eq.s32.totalorder %s1399_s25, 0  ;;  %s1880_s26 = smov (%p35_p0, %s34_s26), 0 }
  0x16   : > { %1833 = sst [smem:[#allocation15_spill]] %s1880_s26  ;;  %s1882_s27 = smov (!%p35_p0, %s41_s27), %s1395_s24 }
  0x17   : > { %s1511_s29 = ssub.s32 %s1391_s23, %s1880_s26  ;;  %p1515_p3 = por %p1819_p2, %p57_p1 }
  0x18   : > { %p43_p4 = scmp.ge.s32.totalorder %s1882_s27, 16  ;;  %s132_s4 = sadd.s32 1, %s1355_s14 }
  0x19   : > { %p1818_p7 = scmp.lt.s32.totalorder %s1399_s25, 32  ;;  %s175_s6 = sand.u32 1, %s1379_s20  }
  0x1a   : > { %s1884_s27 = smov (%p43_p4, %s1882_s27), 0  ;;  %s855_s10 = sshll.u32 %s175_s6, 6 }
  0x1b   : > { %1835 = sst [smem:[#allocation16_spill]] %s1884_s27  ;;  %s45_s5 = ssub.s32 %s1395_s24, %s1884_s27 }
  0x1c   : > { %s47_s7 = sor.u32 %s1511_s29, %s45_s5  ;;  %p130_p8 = scmp.eq.s32.totalorder %s45_s5, 0 }
  0x1d   : > { %p48_p9 = scmp.eq.s32.totalorder %s47_s7, 0  ;;  %s906_s11 = sshll.u32 %s1395_s24, 5 }
  0x1e   : > { %s1531_s8 = scalar_select %p130_p8, %s1355_s14, %s132_s4  }
  0x1f   : > { %s1534_s9 = scalar_select %p48_p9, %s1379_s20, %s50_s28  }
  0x20   : > { %s185_s26 = sadd.s32 %s1391_s23, %s906_s11  ;;  %s179_s22 = scalar_lea.vmem [#allocation3], %s855_s10 }
  0x21   : > { %s858_s3 = sshll.u32 %s185_s26, 6  ;;  %s188_s2 = sshll.u32 %s179_s22, 4  ;;  %s1543_s2 = int_to_ptr.vmem [resolvable:$true] %s188_s2 }
  0x22   : > { %s1836_s0 = sld [smem:[#allocation17_spill]]  ;;  %p1549_p10 = pnand %p1818_p7, %p1515_p3 }
  0x23   : > { %p862_p11 = scmp.ge.s32.totalorder %s1399_s25, 1  ;;  %s1554_s22 = scalar_lea.sflag [#allocation4], %s175_s6 }
  0x24   : > { %p1191_p13 = pneg %p1549_p10 }
  0x28   : > { %s1541_s12 = scalar_lea.hbm %s1836_s0, %s858_s3  ;;  %s1194_s26 = scalar_lea.hbm %s1836_s0, 32768 }
  0x29   : > { %s1189_s1 = scalar_lea.hbm %s1541_s12, 1024  ;;  %p1195_p3 = scmp.lt.u32.totalorder %s1541_s12, %s1836_s0 }
  0x2a   : > { %p1190_p12 = scmp.ne.s32.totalorder %s1541_s12, %s1189_s1  ;;  %p1196_p4 = scmp.lt.u32.totalorder %s1194_s26, %s1189_s1 }
  0x2b   : > { %p1198_p9 = scmp.lt.u32.totalorder %s1189_s1, %s1541_s12 }
  0x2c   : > { %p1192_p0 = pnand %p1191_p13, %p1190_p12  ;;  %p1197_p8 = por %p1196_p4, %p1195_p3 }
  0x2e   : > { %p1193_p1 = pneg %p1192_p0  ;;  %p1199_p7 = por %p1198_p9, %p1197_p8 }
  0x30   : > { %p1200_p2 = pnand %p1199_p7, %p1193_p1 }
  0x32   : > { %1203 = shalt.err (!%p1200_p2)
}
  0x33   : > { %s1204_s5 = scalar_lea.vmem %s1543_s2, 1024  ;;  %s1401_s6 = smov [#allocation3]  }
  0x34   : > { %p1205_p12 = scmp.ne.s32.totalorder %s1543_s2, %s1204_s5  ;;  %s1209_s7 = sshll.u32 %s1401_s6, 4  ;;  %s1210_s7 = int_to_ptr.vmem [resolvable:$false] %s1209_s7 }
  0x35   : > { %s1211_s10 = scalar_lea.vmem %s1210_s7, 2048  ;;  %p1212_p6 = scmp.lt.s32.totalorder %s1543_s2, %s1210_s7 }
  0x36   : > { %p1207_p0 = pnand %p1205_p12, %p1191_p13  ;;  %p1213_p3 = scmp.lt.s32.totalorder %s1211_s10, %s1204_s5 }
  0x38   : > { %p1208_p5 = pneg %p1207_p0  ;;  %p1214_p4 = por %p1213_p3, %p1212_p6 }
  0x3a   : > { %p1215_p8 = pnand %p1214_p4, %p1208_p5 }
  0x3c   : > { %1218 = shalt.err (!%p1215_p8)
}
  0x3d   : > { %s1402_s11 = smov 128   ;;  %s1820_s1 = smov 64  }
  0x3e   : > { %s1821_s3 = smov 4   ;;  %s1838_s21 = sld [smem:[#allocation12_spill]] }
  0x3f   : > { %1045 = dma.hbm_to_vmem [thread:$0]  (!%p1549_p10), %s1541_s12, 1024, %s1543_s2, %s1554_s22, %s1402_s11, %s1820_s1, %s1821_s3  }
  0x40   : > { %p218_p2 = scmp.lt.s32.totalorder %s1399_s25, 33  ;;  %s850_s30 = sadd.s32 4294967295, %s1399_s25  }
  0x41   : > { %s851_s4 = sadd.s32 4294967294, %s1399_s25   ;;  %p64_p6 = scmp.eq.s32.totalorder %s850_s30, 0 }
  0x42   : > { %p1587_p5 = pnand %p862_p11, %p218_p2  ;;  %s78_s5 = sadd.s32 1, %s1367_s17 }
  0x43   : > { %p1840_p7 = scmp.eq.s32.totalorder %s1511_s29, 0  ;;  %p1841_p13 = scmp.ne.s32.totalorder %s1375_s19, %s1371_s18 }
  0x44   : > { %p85_p10 = scmp.ne.s32.totalorder %s1367_s17, %s1363_s16  ;;  %p91_p11 = scmp.ne.s32.totalorder %s1363_s16, %s1359_s15 }
  0x45   : > { %s1597_s6 = scalar_select %p1840_p7, %s1367_s17, %s78_s5  }
  0x46   : > { %p1602_p1 = por %p64_p6, %p1841_p13  ;;  %p142_p9 = scmp.ne.s32.totalorder %s1355_s14, %s1351_s13 }
  0x47   : > { %p1843_p12 = scmp.eq.s32.totalorder %s1399_s25, 0  ;;  %p143_p3 = scmp.eq.s32.totalorder %s850_s30, 31 }
  0x48   : > { %s1842_s28 = scalar_select %p1602_p1, 1, 0 }
  0x49   : > { %p87_p0 = por %p85_p10, %p1843_p12  ;;  %p1614_p4 = por %p91_p11, %p64_p6 }
  0x4a   : > { %p148_p8 = scmp.ne.s32.totalorder %s1351_s13, %s1838_s21  ;;  %p1620_p2 = por %p143_p3, %p142_p9 }
  0x4b   : > { %s1844_s2 = scalar_select %p1614_p4, 1, 0 }
  0x4c   : > { %s1845_s12 = scalar_select %p1620_p2, 1, 0 }
  0x4d   : > { %p149_p7 = scmp.eq.s32.totalorder %s851_s4, 31  ;;  %s198_s18 = sand.u32 1, %s1367_s17  }
  0x4e   : > { %s907_s29 = sshll.u32 %s1391_s23, 10  ;;  %s859_s15 = sshll.u32 %s198_s18, 6 }
  0x4f   : > { %p1626_p13 = por %p149_p7, %p148_p8  ;;  %s1847_s11 = sld [smem:[#allocation18_spill]] }
  0x50   : > { %p1848_p6 = scmp.lt.s32.totalorder %s1399_s25, 32  ;;  %s202_s4 = scalar_lea.vmem [#allocation6], %s859_s15 }
  0x51   : > { %s1846_s22 = scalar_select %p1626_p13, 1, 0 }
  0x52   : > { %p1637_p10 = pnand %p1848_p6, %p87_p0  ;;  %s210_s5 = sshll.u32 %s202_s4, 4  ;;  %s1641_s5 = int_to_ptr.vmem [resolvable:$true] %s210_s5 }
  0x53   : > { %s1643_s1 = scalar_lea.sflag [#allocation7], %s198_s18 }
  0x54   : > { %p1221_p9 = pneg %p1637_p10 }
  0x55   : > { %s1633_s30 = scalar_lea.hbm %s1847_s11, %s907_s29  ;;  %s1224_s3 = scalar_lea.hbm %s1847_s11, 2048 }
  0x56   : > { %s1219_s7 = scalar_lea.hbm %s1633_s30, 1024  ;;  %p1225_p0 = scmp.lt.u32.totalorder %s1633_s30, %s1847_s11 }
  0x57   : > { %p1220_p11 = scmp.ne.s32.totalorder %s1633_s30, %s1219_s7  ;;  %p1226_p8 = scmp.lt.u32.totalorder %s1224_s3, %s1219_s7 }
  0x58   : > { %p1228_p6 = scmp.lt.u32.totalorder %s1219_s7, %s1633_s30 }
  0x59   : > { %p1222_p12 = pnand %p1221_p9, %p1220_p11  ;;  %p1227_p7 = por %p1226_p8, %p1225_p0 }
  0x5b   : > { %p1223_p3 = pneg %p1222_p12  ;;  %p1229_p13 = por %p1228_p6, %p1227_p7 }
  0x5d   : > { %p1230_p2 = pnand %p1229_p13, %p1223_p3 }
  0x5f   : > { %1233 = shalt.err (!%p1230_p2)
}
  0x60   : > { %s1234_s18 = scalar_lea.vmem %s1641_s5, 1024  ;;  %s1405_s15 = smov [#allocation6]  }
  0x61   : > { %p1235_p11 = scmp.ne.s32.totalorder %s1641_s5, %s1234_s18  ;;  %s1239_s4 = sshll.u32 %s1405_s15, 4  ;;  %s1240_s4 = int_to_ptr.vmem [resolvable:$false] %s1239_s4 }
  0x62   : > { %s1241_s0 = scalar_lea.vmem %s1240_s4, 2048  ;;  %p1242_p1 = scmp.lt.s32.totalorder %s1641_s5, %s1240_s4 }
  0x63   : > { %p1237_p12 = pnand %p1235_p11, %p1221_p9  ;;  %p1243_p0 = scmp.lt.s32.totalorder %s1241_s0, %s1234_s18 }
  0x65   : > { %p1238_p4 = pneg %p1237_p12  ;;  %p1244_p8 = por %p1243_p0, %p1242_p1 }
  0x67   : > { %p1245_p7 = pnand %p1244_p8, %p1238_p4 }
  0x69   : > { %1248 = shalt.err (!%p1245_p7)
}
  0x6a   : > { %s1850_s27 = smov 4   ;;  %s1851_s3 = smov 64  }
  0x6b   : > { %1048 = dma.hbm_to_vmem [thread:$0]  (!%p1637_p10), %s1633_s30, 1024, %s1641_s5, %s1643_s1, %s1851_s3, %s1851_s3, %s1850_s27  }
  0x6c   : > { %222 = sbr.rel (%p1587_p5) target bundleno = 438 (0x1b6), region = 32  ;;  %s224_s7 = sand.u32 (!%p1587_p5), 1, %s1375_s19  }
  0x6d   : > { %s863_s29 = sshll.u32 (!%p1587_p5), %s224_s7, 6  ;;  %s225_s10 = scalar_lea.sflag (!%p1587_p5), [#allocation4], %s224_s7 }
  0x6e   : > { %s1677_s18 = scalar_lea.vmem (!%p1587_p5), [#allocation3], %s863_s29  ;;  %p1852_p1 = scmp.ne.s32.totalorder (!%p1587_p5), %s1842_s28, 0 }
  0x73   : > { %1334 = dma.done.wait (%p1852_p1), %s225_s10, 1024  }
  0x74   : > { %1336 = vsyncadd (%p1852_p1), %s225_s10, 4294966272  ;;  %s233_s21 = sand.u32 1, %s1363_s16   ;;  %p1853_p5 = scmp.ne.s32.totalorder %s1844_s2, 0 }
  0x75   : > { %s864_s15 = sshll.u32 %s233_s21, 6  ;;  %s234_s1 = scalar_lea.sflag [#allocation7], %s233_s21 }
  0x76   : > { %s1684_s30 = scalar_lea.vmem [#allocation6], %s864_s15 }
  0x77   : > { %1338 = dma.done.wait (%p1853_p5), %s234_s1, 1024  }
  0x78   : > { %1340 = vsyncadd (%p1853_p5), %s234_s1, 4294966272  ;;  %s265_s26 = sand.u32 1, %s1351_s13   ;;  %s1854_s28 = sld [smem:[#allocation13_spill]] }
  0x79   : > { %s865_s5 = sshll.u32 %s265_s26, 6 }
  0x7a   : > { %s1693_s4 = scalar_lea.vmem [#allocation8], %s865_s5 }
  0x7e   : > { %p866_p4 = scmp.ne.s32.totalorder %s1854_s28, 0 }
  0x7f   : > { %v1406_v0 = vmov (!%p866_p4), 0.0  }
  0x80   : > { %278 = sbr.rel (%p866_p4) target bundleno = 136 (0x88), region = 44  ;;  %279 = vst [vmem:[#allocation2] sm:$0xff] (!%p866_p4), %v1406_v0  ;;  %280 = vst [vmem:[#allocation2 + $0x8] sm:$0xff] (!%p866_p4), %v1406_v0 }
  0x81   : > { %281 = vst [vmem:[#allocation2 + $0x10] sm:$0xff] (!%p866_p4), %v1406_v0  ;;  %282 = vst [vmem:[#allocation2 + $0x18] sm:$0xff] (!%p866_p4), %v1406_v0 }
  0x82   : > { %283 = vst [vmem:[#allocation2 + $0x20] sm:$0xff] (!%p866_p4), %v1406_v0  ;;  %284 = vst [vmem:[#allocation2 + $0x28] sm:$0xff] (!%p866_p4), %v1406_v0 }
  0x83   : > { %285 = vst [vmem:[#allocation2 + $0x30] sm:$0xff] (!%p866_p4), %v1406_v0  ;;  %286 = vst [vmem:[#allocation2 + $0x38] sm:$0xff] (!%p866_p4), %v1406_v0 }
  0x84   : > { %287 = vst [vmem:[#allocation2 + $0x40] sm:$0xff] (!%p866_p4), %v1406_v0  ;;  %288 = vst [vmem:[#allocation2 + $0x48] sm:$0xff] (!%p866_p4), %v1406_v0 }
  0x85   : > { %289 = vst [vmem:[#allocation2 + $0x50] sm:$0xff] (!%p866_p4), %v1406_v0  ;;  %290 = vst [vmem:[#allocation2 + $0x58] sm:$0xff] (!%p866_p4), %v1406_v0 }
  0x86   : > { %291 = vst [vmem:[#allocation2 + $0x60] sm:$0xff] (!%p866_p4), %v1406_v0  ;;  %292 = vst [vmem:[#allocation2 + $0x68] sm:$0xff] (!%p866_p4), %v1406_v0 }
  0x87   : > { %293 = vst [vmem:[#allocation2 + $0x70] sm:$0xff] %v1406_v0  ;;  %294 = vst [vmem:[#allocation2 + $0x78] sm:$0xff] %v1406_v0 }
  0x88 PF: > { %v1173_v1 = vld [vmem:[%s1684_s30] sm:$0xff]   ;;  %v1174_v2 = vld [vmem:[%s1684_s30 + $0x8] sm:$0xff]   ;;  %v1175_v3 = vld [vmem:[%s1684_s30 + $0x10] sm:$0xff]   ;;  %s1855_s2 = sld [smem:[#allocation13_spill]] }
  0x89   : > { %988 = vmatprep.subr.bf16.mxu0 %v1173_v1  ;;  %1020 = vmatprep.subr.bf16.mxu1 %v1173_v1  ;;  %v1176_v4 = vld [vmem:[%s1684_s30 + $0x18] sm:$0xff]   ;;  %v1181_v5 = vld [vmem:[%s1677_s18] sm:$0xff]   ;;  %v1178_v8 = vld [vmem:[%s1684_s30 + $0x28] sm:$0xff]  }
  0x8a   : > { %989 = vmatpush3.bf16.msra.mxu0 %v1173_v1  ;;  %1028 = vmatpush3.bf16.msra.mxu1 %v1173_v1  ;;  %v1182_v6 = vld [vmem:[%s1677_s18 + $0x20] sm:$0xff]   ;;  %v1179_v9 = vld [vmem:[%s1684_s30 + $0x30] sm:$0xff]   ;;  %v1180_v10 = vld [vmem:[%s1684_s30 + $0x38] sm:$0xff]  }
  0x8b   : > { %990 = vmatprep.subr.bf16.mxu0 %v1174_v2  ;;  %1021 = vmatprep.subr.bf16.mxu1 %v1174_v2  ;;  %v1177_v7 = vld [vmem:[%s1684_s30 + $0x20] sm:$0xff]   ;;  %v1183_v11 = vld [vmem:[%s1677_s18 + $0x8] sm:$0xff]   ;;  %v1185_v13 = vld [vmem:[%s1677_s18 + $0x10] sm:$0xff]  }
  0x8c   : > { %1004 = vmatprep.mubr.bf16.mxu0 %v1181_v5  ;;  %1012 = vmatprep.mubr.bf16.mxu1 %v1182_v6  ;;  %v1184_v12 = vld [vmem:[%s1677_s18 + $0x28] sm:$0xff]   ;;  %v1186_v14 = vld [vmem:[%s1677_s18 + $0x30] sm:$0xff]   ;;  %v1187_v15 = vld [vmem:[%s1677_s18 + $0x18] sm:$0xff]  }
  0x8d   : > { %v1188_v16 = vld [vmem:[%s1677_s18 + $0x38] sm:$0xff]   ;;  %v297_v17 = vld [vmem:[#allocation2 + $0x10] sm:$0xff]  ;;  %v295_v19 = vld [vmem:[#allocation2] sm:$0xff] }
  0x8e   : > { %991 = vmatpush3.bf16.msra.mxu0 %v1174_v2  ;;  %1029 = vmatpush3.bf16.msra.mxu1 %v1174_v2  ;;  %v305_v18 = vld [vmem:[#allocation2 + $0x50] sm:$0xff]  ;;  %v303_v20 = vld [vmem:[#allocation2 + $0x40] sm:$0xff]  ;;  %v298_v23 = vld [vmem:[#allocation2 + $0x18] sm:$0xff]  ;;  %p883_p2 = scmp.ne.s32.totalorder %s1855_s2, 1 }
  0x8f   : > { %992 = vmatprep.subr.bf16.mxu0 %v1175_v3  ;;  %1022 = vmatprep.subr.bf16.mxu1 %v1175_v3  ;;  %v306_v24 = vld [vmem:[#allocation2 + $0x58] sm:$0xff]  ;;  %v296_v29 = vld [vmem:[#allocation2 + $0x8] sm:$0xff]  ;;  %v301_v41 = vld [vmem:[#allocation2 + $0x30] sm:$0xff]  ;;  %s1856_s3 = sld [smem:[#allocation19_spill]] (!%p883_p2) }
  0x90   : > { %v304_v30 = vld [vmem:[#allocation2 + $0x48] sm:$0xff]  ;;  %v309_v42 = vld [vmem:[#allocation2 + $0x70] sm:$0xff]  ;;  %v299_v43 = vld [vmem:[#allocation2 + $0x20] sm:$0xff] }
  0x91   : > { %v307_v44 = vld [vmem:[#allocation2 + $0x60] sm:$0xff]  ;;  %v302_v47 = vld [vmem:[#allocation2 + $0x38] sm:$0xff]  ;;  %v300_v53 = vld [vmem:[#allocation2 + $0x28] sm:$0xff] }
  0x92   : > { %993 = vmatpush3.bf16.msra.mxu0 %v1175_v3  ;;  %1030 = vmatpush3.bf16.msra.mxu1 %v1175_v3  ;;  %v310_v48 = vld [vmem:[#allocation2 + $0x78] sm:$0xff]  ;;  %v308_v54 = vld [vmem:[#allocation2 + $0x68] sm:$0xff] }
  0x93   : > { %994 = vmatprep.subr.bf16.mxu0 %v1176_v4  ;;  %1023 = vmatprep.subr.bf16.mxu1 %v1176_v4 }
  0x95   : > { %v884_v3 = vld [vmem:[%s1856_s3] ss:$0 sm:$0xff] (!%p883_p2) }
  0x96   : > { %995 = vmatpush3.bf16.msra.mxu0 %v1176_v4  ;;  %1031 = vmatpush3.bf16.msra.mxu1 %v1176_v4 }
  0x97   : > { %996 = vmatprep.subr.bf16.mxu0 %v1177_v7  ;;  %1024 = vmatprep.subr.bf16.mxu1 %v1177_v7 }
  0x9a   : > { %997 = vmatpush3.bf16.msra.mxu0 %v1177_v7  ;;  %1032 = vmatpush3.bf16.msra.mxu1 %v1177_v7 }
  0x9b   : > { %998 = vmatprep.subr.bf16.mxu0 %v1178_v8  ;;  %1025 = vmatprep.subr.bf16.mxu1 %v1178_v8 }
  0x9e   : > { %999 = vmatpush3.bf16.msra.mxu0 %v1178_v8  ;;  %1033 = vmatpush3.bf16.msra.mxu1 %v1178_v8 }
  0x9f   : > { %1000 = vmatprep.subr.bf16.mxu0 %v1179_v9  ;;  %1026 = vmatprep.subr.bf16.mxu1 %v1179_v9 }
  0xa2   : > { %1001 = vmatpush3.bf16.msra.mxu0 %v1179_v9  ;;  %1034 = vmatpush3.bf16.msra.mxu1 %v1179_v9 }
  0xa3   : > { %1002 = vmatprep.subr.bf16.mxu0 %v1180_v10  ;;  %1027 = vmatprep.subr.bf16.mxu1 %v1180_v10 }
  0xa6   : > { %1003 = vmatpush3.bf16.msra.mxu0 %v1180_v10  ;;  %1035 = vmatpush3.bf16.msra.mxu1 %v1180_v10 }
  0xa9   : > { %1005 = vmatmul.mubr.bf16.vlgmr.msra.gmra.mrb[0].mxu0 %v1183_v11  ;;  %1013 = vmatmul.mubr.bf16.vlgmr.msra.gmra.mrb[0].mxu1 %v1184_v12 }
  0xaa   : > { %1008 = vmatprep.mubr.bf16.mxu0 %v1185_v13  ;;  %1016 = vmatprep.mubr.bf16.mxu1 %v1186_v14 }
  0xb1   : > { %1009 = vmatmul.mubr.bf16.gmra.mrb[4].mxu0 %v1187_v15  ;;  %1017 = vmatmul.mubr.bf16.gmra.mrb[4].mxu1 %v1188_v16 }
 0x17c   : > { %v1006_v21 = vpop.f32.mrb[0].mxu0  ;;  %v1014_v22 = vpop.f32.mrb[0].mxu1 }
 0x17d   : > { %v538_v25 = vadd.f32 %v1006_v21, %v297_v17  ;;  %v546_v26 = vadd.f32 %v1014_v22, %v305_v18  ;;  %v473_v27 = vpop.f32.mrb[1].mxu0  ;;  %v505_v28 = vpop.f32.mrb[1].mxu1 }
 0x17e   : > { %v536_v31 = vadd.f32 %v473_v27, %v295_v19  ;;  %v544_v32 = vadd.f32 %v505_v28, %v303_v20  ;;  %v1007_v33 = vpop.f32.mrb[2].mxu0  ;;  %v1015_v34 = vpop.f32.mrb[2].mxu1 }
 0x17f   : > { %554 = vst [vmem:[#allocation2 + $0x10] sm:$0xff] %v538_v25  ;;  %562 = vst [vmem:[#allocation2 + $0x50] sm:$0xff] %v546_v26  ;;  %v539_v35 = vadd.f32 %v1007_v33, %v298_v23  ;;  %v547_v36 = vadd.f32 %v1015_v34, %v306_v24  ;;  %v476_v37 = vpop.f32.mrb[3].mxu0  ;;  %v508_v38 = vpop.f32.mrb[3].mxu1 }
 0x180   : > { %552 = vst [vmem:[#allocation2] sm:$0xff] %v536_v31  ;;  %560 = vst [vmem:[#allocation2 + $0x40] sm:$0xff] %v544_v32  ;;  %v537_v39 = vadd.f32 %v476_v37, %v296_v29  ;;  %v545_v40 = vadd.f32 %v508_v38, %v304_v30 }
 0x181   : > { %555 = vst [vmem:[#allocation2 + $0x18] sm:$0xff] %v539_v35  ;;  %563 = vst [vmem:[#allocation2 + $0x58] sm:$0xff] %v547_v36 }
 0x182   : > { %553 = vst [vmem:[#allocation2 + $0x8] sm:$0xff] %v537_v39  ;;  %561 = vst [vmem:[#allocation2 + $0x48] sm:$0xff] %v545_v40 }
 0x184   : > { %v1010_v45 = vpop.f32.mrb[4].mxu0  ;;  %v1018_v46 = vpop.f32.mrb[4].mxu1  ;;  %571 = sbr.rel (%p883_p2) target bundleno = 410 (0x19a), region = 48 }
 0x185   : > { %v542_v49 = vadd.f32 %v1010_v45, %v301_v41  ;;  %v550_v50 = vadd.f32 %v1018_v46, %v309_v42  ;;  %v489_v51 = vpop.f32.mrb[5].mxu0  ;;  %v521_v52 = vpop.f32.mrb[5].mxu1 }
 0x186   : > { %v540_v55 = vadd.f32 %v489_v51, %v299_v43  ;;  %v548_v56 = vadd.f32 %v521_v52, %v307_v44  ;;  %v1011_v57 = vpop.f32.mrb[6].mxu0  ;;  %v1019_v58 = vpop.f32.mrb[6].mxu1  ;;  %v574_v6 = vld [vmem:[#allocation2 + $0x10] sm:$0xff] (!%p883_p2) }
 0x187   : > { %558 = vst [vmem:[#allocation2 + $0x30] sm:$0xff] %v542_v49  ;;  %566 = vst [vmem:[#allocation2 + $0x70] sm:$0xff] %v550_v50  ;;  %v543_v59 = vadd.f32 %v1011_v57, %v302_v47  ;;  %v551_v60 = vadd.f32 %v1019_v58, %v310_v48  ;;  %v492_v61 = vpop.f32.mrb[7].mxu0  ;;  %v524_v62 = vpop.f32.mrb[7].mxu1  ;;  %v572_v1 = vld [vmem:[#allocation2] sm:$0xff] (!%p883_p2)  ;;  %v597_v9 = vadd.f32 (!%p883_p2), %v884_v3, %v574_v6  ;;  %v582_v21 = vld [vmem:[#allocation2 + $0x50] sm:$0xff] (!%p883_p2) }
 0x188   : > { %556 = vst [vmem:[#allocation2 + $0x20] sm:$0xff] %v540_v55  ;;  %564 = vst [vmem:[#allocation2 + $0x60] sm:$0xff] %v548_v56  ;;  %v541_v63 = vadd.f32 %v492_v61, %v300_v53  ;;  %v549_v0 = vadd.f32 %v524_v62, %v308_v54  ;;  %v595_v4 = vadd.f32 (!%p883_p2), %v884_v3, %v572_v1  ;;  %v575_v7 = vld [vmem:[#allocation2 + $0x18] sm:$0xff] (!%p883_p2)  ;;  %v580_v19 = vld [vmem:[#allocation2 + $0x40] sm:$0xff] (!%p883_p2) }
 0x189   : > { %559 = vst [vmem:[#allocation2 + $0x38] sm:$0xff] %v543_v59  ;;  %567 = vst [vmem:[#allocation2 + $0x78] sm:$0xff] %v551_v60  ;;  %v573_v2 = vld [vmem:[#allocation2 + $0x8] sm:$0xff] (!%p883_p2)  ;;  %v598_v10 = vadd.f32 (!%p883_p2), %v884_v3, %v575_v7  ;;  %v613_v22 = vmax.f32 (!%p883_p2), %v597_v9, 0.0  ;;  %v583_v26 = vld [vmem:[#allocation2 + $0x58] sm:$0xff] (!%p883_p2)  ;;  %v603_v31 = vadd.f32 (!%p883_p2), %v884_v3, %v580_v19  ;;  %v605_v36 = vadd.f32 (!%p883_p2), %v884_v3, %v582_v21 }
 0x18a   : > { %557 = vst [vmem:[#allocation2 + $0x28] sm:$0xff] %v541_v63  ;;  %565 = vst [vmem:[#allocation2 + $0x68] sm:$0xff] %v549_v0  ;;  %v596_v5 = vadd.f32 (!%p883_p2), %v884_v3, %v573_v2  ;;  %v611_v15 = vmax.f32 (!%p883_p2), %v595_v4, 0.0  ;;  %v581_v20 = vld [vmem:[#allocation2 + $0x48] sm:$0xff] (!%p883_p2)  ;;  %v606_v41 = vadd.f32 (!%p883_p2), %v884_v3, %v583_v26 }
 0x18b   : > { %v614_v23 = vmax.f32 %v598_v10, 0.0  ;;  %v604_v35 = vadd.f32 %v884_v3, %v581_v20  ;;  %v619_v40 = vmax.f32 %v603_v31, 0.0  ;;  %v621_v45 = vmax.f32 %v605_v36, 0.0 }
 0x18c   : > { %v612_v16 = vmax.f32 %v596_v5, 0.0  ;;  %v622_v47 = vmax.f32 %v606_v41, 0.0 }
 0x18d   : > { %v933_v33 = vpack.c.bf16 %v614_v23, %v613_v22  ;;  %v620_v44 = vmax.f32 %v604_v35, 0.0 }
 0x18e   : > { %v578_v13 = vld [vmem:[#allocation2 + $0x30] sm:$0xff]  ;;  %v928_v28 = vpack.c.bf16 %v612_v16, %v611_v15  ;;  %v953_v53 = vpack.c.bf16 %v622_v47, %v621_v45 }
 0x18f   : > { %v576_v8 = vld [vmem:[#allocation2 + $0x20] sm:$0xff]  ;;  %v601_v18 = vadd.f32 %v884_v3, %v578_v13  ;;  %v586_v37 = vld [vmem:[#allocation2 + $0x70] sm:$0xff]  ;;  %965 = vst [vmem:[%s1693_s4 + $0x8] sm:$0xff] %v933_v33   ;;  %v948_v51 = vpack.c.bf16 %v620_v44, %v619_v40 }
 0x190   : > { %v599_v12 = vadd.f32 %v884_v3, %v576_v8  ;;  %v579_v14 = vld [vmem:[#allocation2 + $0x38] sm:$0xff]  ;;  %v584_v27 = vld [vmem:[#allocation2 + $0x60] sm:$0xff]  ;;  %929 = vst [vmem:[%s1693_s4] sm:$0xff] %v928_v28   ;;  %v609_v49 = vadd.f32 %v884_v3, %v586_v37  ;;  %969 = vst [vmem:[%s1693_s4 + $0x28] sm:$0xff] %v953_v53  }
 0x191   : > { %v577_v11 = vld [vmem:[#allocation2 + $0x28] sm:$0xff]  ;;  %v602_v25 = vadd.f32 %v884_v3, %v579_v14  ;;  %v617_v30 = vmax.f32 %v601_v18, 0.0  ;;  %v587_v38 = vld [vmem:[#allocation2 + $0x78] sm:$0xff]  ;;  %v607_v42 = vadd.f32 %v884_v3, %v584_v27  ;;  %968 = vst [vmem:[%s1693_s4 + $0x20] sm:$0xff] %v948_v51  }
 0x192   : > { %v600_v17 = vadd.f32 %v884_v3, %v577_v11  ;;  %v615_v24 = vmax.f32 %v599_v12, 0.0  ;;  %v585_v32 = vld [vmem:[#allocation2 + $0x68] sm:$0xff]  ;;  %v610_v50 = vadd.f32 %v884_v3, %v587_v38  ;;  %v625_v54 = vmax.f32 %v609_v49, 0.0 }
 0x193   : > { %v618_v34 = vmax.f32 %v602_v25, 0.0  ;;  %v608_v46 = vadd.f32 %v884_v3, %v585_v32  ;;  %v623_v48 = vmax.f32 %v607_v42, 0.0 }
 0x194   : > { %v616_v29 = vmax.f32 %v600_v17, 0.0  ;;  %v626_v55 = vmax.f32 %v610_v50, 0.0 }
 0x195   : > { %v943_v43 = vpack.c.bf16 %v618_v34, %v617_v30  ;;  %v624_v52 = vmax.f32 %v608_v46, 0.0 }
 0x196   : > { %v938_v39 = vpack.c.bf16 %v616_v29, %v615_v24  ;;  %v963_v57 = vpack.c.bf16 %v626_v55, %v625_v54 }
 0x197   : > { %967 = vst [vmem:[%s1693_s4 + $0x18] sm:$0xff] %v943_v43   ;;  %v958_v56 = vpack.c.bf16 %v624_v52, %v623_v48 }
 0x198   : > { %966 = vst [vmem:[%s1693_s4 + $0x10] sm:$0xff] %v938_v39   ;;  %971 = vst [vmem:[%s1693_s4 + $0x38] sm:$0xff] %v963_v57  }
 0x199   : > { %970 = vst [vmem:[%s1693_s4 + $0x30] sm:$0xff] %v958_v56  }
 0x19a PF: > { %s1857_s7 = sld [smem:[#allocation14_spill]]  ;;  %s1858_s21 = sld [smem:[#allocation20_spill]] }
 0x19b   : > { %s722_s30 = sshll.u32 %s1693_s4, 4  ;;  %s1735_s5 = scalar_lea.sflag [#allocation5], %s265_s26  ;;  %s1731_s30 = int_to_ptr.vmem [resolvable:$true] %s722_s30 }
 0x19c   : > { %s1249_s28 = scalar_lea.vmem %s1731_s30, 1024  ;;  %p1860_p10 = scmp.ne.s32.totalorder %s1845_s12, 0 }
 0x19d   : > { %p1250_p13 = scmp.ne.s32.totalorder %s1731_s30, %s1249_s28  ;;  %s1407_s2 = smov [#allocation8]  }
 0x19e   : > { %s1253_s0 = sshll.u32 %s1407_s2, 4  ;;  %s1254_s0 = int_to_ptr.vmem [resolvable:$false] %s1253_s0 }
 0x19f   : > { %p1251_p9 = pnand %p1250_p13, %p1860_p10  ;;  %s1255_s27 = scalar_lea.vmem %s1254_s0, 2048 }
 0x1a0   : > { %s924_s29 = sshll.u32 %s1857_s7, 10  ;;  %s1859_s1 = smov %s1858_s21 }
 0x1a1   : > { %s1728_s15 = scalar_lea.hbm %s1858_s21, %s924_s29  ;;  %p1252_p3 = pneg %p1251_p9 }
 0x1a2   : > { %p1256_p6 = scmp.lt.s32.totalorder %s1731_s30, %s1254_s0  ;;  %p1257_p11 = scmp.lt.s32.totalorder %s1255_s27, %s1249_s28 }
 0x1a4   : > { %p1258_p12 = por %p1257_p11, %p1256_p6 }
 0x1a6   : > { %p1259_p0 = pnand %p1258_p12, %p1252_p3 }
 0x1a8   : > { %1262 = shalt.err (!%p1259_p0)
}
 0x1a9   : > { %s1263_s26 = scalar_lea.hbm %s1728_s15, 1024  ;;  %s1267_s7 = scalar_lea.hbm %s1859_s1, 16384 }
 0x1aa   : > { %p1264_p8 = scmp.ne.s32.totalorder %s1728_s15, %s1263_s26  ;;  %p1268_p5 = scmp.lt.u32.totalorder %s1728_s15, %s1859_s1 }
 0x1ab   : > { %p1269_p4 = scmp.lt.u32.totalorder %s1267_s7, %s1263_s26  ;;  %p1271_p13 = scmp.lt.u32.totalorder %s1263_s26, %s1728_s15 }
 0x1ac   : > { %p1265_p7 = pnand %p1264_p8, %p1860_p10 }
 0x1ad   : > { %p1270_p2 = por %p1269_p4, %p1268_p5 }
 0x1ae   : > { %p1266_p1 = pneg %p1265_p7 }
 0x1af   : > { %p1272_p9 = por %p1271_p13, %p1270_p2 }
 0x1b1   : > { %p1273_p3 = pnand %p1272_p9, %p1266_p1 }
 0x1b3   : > { %1276 = shalt.err (!%p1273_p3)
}
 0x1b4   : > { %s1408_s18 = smov 64   ;;  %s1409_s21 = smov 4  }
 0x1b5   : > { %1040 = dma.vmem_to_hbm [thread:$0]  (%p1860_p10), %s1731_s30, 1024, %s1728_s15, %s1735_s5, %s1408_s18, %s1408_s18, %s1409_s21  }
 0x1b6 PF: > { %s1861_s28 = sld [smem:[#allocation12_spill]]  ;;  %p1054_p6 = scmp.ge.s32.totalorder %s1399_s25, 2 }
 0x1b7   : > { %p1862_p11 = scmp.ne.s32.totalorder %s1846_s22, 0 }
 0x1b9   : > { %p1050_p12 = pnand %p1054_p6, %p1862_p11 }
 0x1bc   : > { %s737_s2 = sand.u32 1, %s1861_s28  }
 0x1bd   : > { %s738_s0 = scalar_lea.sflag [#allocation5], %s737_s2 }
 0x1be   : > { %1342 = dma.done.wait (!%p1050_p12), %s738_s0, 1024  }
 0x1bf   : > { %1344 = vsyncadd (!%p1050_p12), %s738_s0, 4294966272  ;;  %s22_s25 = sadd.s32 1, %s1399_s25   ;;  %s1864_s30 = sld [smem:[#allocation15_spill]] }
 0x1c0   : > { %p1764_p0 = scmp.ge.s32.totalorder %s22_s25, 34   ;;  %s1865_s5 = sld [smem:[#allocation16_spill]] }
 0x1c1   : > { %s1866_s12 = smov %s1351_s13  ;;  %s1867_s13 = smov %s1355_s14 }
 0x1c2   : > { %s1868_s14 = smov %s1531_s8  ;;  %s1869_s15 = smov %s1363_s16 }
 0x1c3   : > { %s1870_s16 = smov %s1367_s17  ;;  %s1871_s17 = smov %s1597_s6 }
 0x1c4   : > { %s1872_s18 = smov %s1375_s19  ;;  %s1873_s19 = smov %s1379_s20 }
 0x1c5   : > { %s1874_s20 = smov %s1534_s9  ;;  %s1875_s21 = smov %s1391_s23 }
 0x1c6   : > { %s1876_s22 = smov %s1395_s24  ;;  %s1877_s23 = smov %s1864_s30 }
 0x1c7   : > { %s1878_s24 = smov %s1865_s5  ;;  %21 = sbr.rel (!%p1764_p0) target bundleno = 17 (0x11), region = 101 }
 0x1ce   :  { %743 = vsyncpa [#allocation4], 1 }
 0x1cf   :  { %745 = vsyncpa [#allocation4 + $0x1], 1 }
 0x1d0   :  { %746 = vsyncpa [#allocation7], 1 }
 0x1d1   :  { %748 = vsyncpa [#allocation7 + $0x1], 1 }
 0x1d2   :  { %749 = vsyncpa [#allocation5], 1 }
 0x1d3   :  { %751 = vsyncpa [#allocation5 + $0x1], 1 }

</bundles_post_ra>
